<compile_context>
chip_gen: v6e
topology: v6e:2x2x1
jax: 0.10.0
libtpu: 0.0.40
codegen_flags: <defaults>
</compile_context>

<pallas_src>
import jax
import jax.numpy as jnp
from jax.experimental import pallas as pl
from jax.experimental.pallas import tpu as pltpu


LANE = 128  # TPU lane width; embedding dim is padded up to a lane multiple.


def _round_up(x, m):
    return (x + m - 1) // m * m


# Whole-array-in-VMEM spec (no grid: kernel sees full operands resident).
_VMEM_SPEC = pl.BlockSpec(memory_space=pltpu.MemorySpace.VMEM)


def _mlp(x_bf16, w1, b1, w2, b2):
    # x_bf16: (B, D_in) bf16 | w1: (D_in, H) bf16 | b1: (1, H) f32
    # w2: (H, E_pad) bf16    | b2: (1, E_pad) f32
    h = jnp.dot(x_bf16, w1, preferred_element_type=jnp.float32) + b1
    h = jnp.maximum(h, 0.0).astype(jnp.bfloat16)   # ReLU on VPU, bf16 for MXU
    return jnp.dot(h, w2, preferred_element_type=jnp.float32) + b2


def _triplet_kernel(x1_ref, x2_ref, x3_ref, w1_ref, b1_ref, w2_ref, b2_ref,
                    o1_ref, o2_ref, o3_ref):
    # Shared weights: read from VMEM once, reuse for all three branches.
    w1 = w1_ref[...]
    b1 = b1_ref[...]
    w2 = w2_ref[...]
    b2 = b2_ref[...]
    # Static (unrolled) loop: three MXU matmul pairs, three full-ref stores.
    for x_ref, o_ref in ((x1_ref, o1_ref), (x2_ref, o2_ref), (x3_ref, o3_ref)):
        y = _mlp(x_ref[...].astype(jnp.bfloat16), w1, b1, w2, b2)
        o_ref[...] = y.astype(o_ref.dtype)


def _single_kernel(x_ref, w1_ref, b1_ref, w2_ref, b2_ref, o_ref):
    y = _mlp(x_ref[...].astype(jnp.bfloat16),
             w1_ref[...], b1_ref[...], w2_ref[...], b2_ref[...])
    o_ref[...] = y.astype(o_ref.dtype)


def _cost(n_inputs, b, d_in, hidden, e_pad, in_itemsize, w1, b1, w2, b2):
    flops = n_inputs * (2 * b * d_in * hidden + 2 * b * hidden * e_pad)
    bytes_accessed = (
        n_inputs * b * d_in * in_itemsize
        + w1.size * w1.dtype.itemsize + b1.size * b1.dtype.itemsize
        + w2.size * w2.dtype.itemsize + b2.size * b2.dtype.itemsize
        + n_inputs * b * e_pad * 4
    )
    return pl.CostEstimate(flops=flops, transcendentals=0,
                           bytes_accessed=bytes_accessed)


@jax.jit
def _triplet_embed(x1f, x2f, x3f, w1, b1, w2, b2):
    """Three (B, D_in) inputs, shared weights -> three (B, E_pad) embeddings."""
    B, D_in = x1f.shape
    H = w1.shape[1]
    E_pad = w2.shape[1]
    out_sds = jax.ShapeDtypeStruct((B, E_pad), jnp.float32)
    return pl.pallas_call(
        _triplet_kernel,
        out_shape=(out_sds, out_sds, out_sds),
        in_specs=[_VMEM_SPEC] * 7,
        out_specs=(_VMEM_SPEC, _VMEM_SPEC, _VMEM_SPEC),
        cost_estimate=_cost(3, B, D_in, H, E_pad, x1f.dtype.itemsize,
                            w1, b1, w2, b2),
    )(x1f, x2f, x3f, w1, b1, w2, b2)


@jax.jit
def _single_embed(xf, w1, b1, w2, b2):
    """One (B, D_in) input -> (B, E_pad) padded embedding (get_embedding path)."""
    B, D_in = xf.shape
    H = w1.shape[1]
    E_pad = w2.shape[1]
    return pl.pallas_call(
        _single_kernel,
        out_shape=jax.ShapeDtypeStruct((B, E_pad), jnp.float32),
        in_specs=[_VMEM_SPEC] * 5,
        out_specs=_VMEM_SPEC,
        cost_estimate=_cost(1, B, D_in, H, E_pad, xf.dtype.itemsize,
                            w1, b1, w2, b2),
    )(xf, w1, b1, w2, b2)


class TripletNet:
    """JAX/Pallas port of TripletNet(embedding_net) with an MLP embedding net."""

    def __init__(self, d_in, hidden, embed_dim, key):
        k1, k2, k3, k4 = jax.random.split(key, 4)
        self.embed_dim = embed_dim
        e_pad = _round_up(embed_dim, LANE)
        # bf16 weights for the MXU (f32 accumulation in-kernel); f32 biases.
        self.w1 = (jax.random.normal(k1, (d_in, hidden), jnp.float32)
                   / jnp.sqrt(d_in)).astype(jnp.bfloat16)
        self.b1 = jax.random.normal(k2, (1, hidden), jnp.float32) * 0.01
        w2 = (jax.random.normal(k3, (hidden, embed_dim), jnp.float32)
              / jnp.sqrt(hidden)).astype(jnp.bfloat16)
        b2 = jax.random.normal(k4, (1, embed_dim), jnp.float32) * 0.01
        # Zero-pad the embedding dim to a lane multiple (lane-dense stores);
        # padded columns produce zeros and are sliced off in the wrapper.
        self.w2 = jnp.zeros((hidden, e_pad), jnp.bfloat16).at[:, :embed_dim].set(w2)
        self.b2 = jnp.zeros((1, e_pad), jnp.float32).at[:, :embed_dim].set(b2)

    @staticmethod
    def _flatten(x):
        # NCHW -> (B, C*H*W), row-major like torch .view(B, -1)
        return x.reshape(x.shape[0], -1)

    def forward(self, x1, x2, x3):
        E = self.embed_dim
        o1, o2, o3 = _triplet_embed(self._flatten(x1), self._flatten(x2),
                                    self._flatten(x3),
                                    self.w1, self.b1, self.w2, self.b2)
        return o1[:, :E], o2[:, :E], o3[:, :E]

    def get_embedding(self, x):
        out = _single_embed(self._flatten(x),
                            self.w1, self.b1, self.w2, self.b2)
        return out[:, :self.embed_dim]


if __name__ == "__main__":
    key = jax.random.PRNGKey(0)
    k_in1, k_in2, k_in3, k_param = jax.random.split(key, 4)

    # small NCHW inputs: batch=2, channels=4, spatial=8x8 -> D_in = 256
    B, C, Hs, Ws = 2, 4, 8, 8
    x1 = jax.random.normal(k_in1, (B, C, Hs, Ws), jnp.float32)
    x2 = jax.random.normal(k_in2, (B, C, Hs, Ws), jnp.float32)
    x3 = jax.random.normal(k_in3, (B, C, Hs, Ws), jnp.float32)

    E = 32
    model = TripletNet(d_in=C * Hs * Ws, hidden=128, embed_dim=E, key=k_param)

    o1, o2, o3 = model.forward(x1, x2, x3)
    e1 = model.get_embedding(x1)
    jax.block_until_ready((o1, o2, o3, e1))

    # reference check in plain JAX (same math: bf16 operands, f32 accumulation)
    def ref_embed(x):
        xf = x.reshape(x.shape[0], -1).astype(jnp.bfloat16)
        h = jnp.maximum(
            jnp.dot(xf, model.w1, preferred_element_type=jnp.float32)
            + model.b1, 0.0)
        y = jnp.dot(h.astype(jnp.bfloat16), model.w2,
                    preferred_element_type=jnp.float32) + model.b2
        return y[:, :E]

    r1, r2, r3 = ref_embed(x1), ref_embed(x2), ref_embed(x3)
    assert o1.shape == (B, E) and o2.shape == (B, E) and o3.shape == (B, E)
    assert jnp.allclose(o1, r1, atol=1e-2, rtol=1e-2)
    assert jnp.allclose(o2, r2, atol=1e-2, rtol=1e-2)
    assert jnp.allclose(o3, r3, atol=1e-2, rtol=1e-2)
    assert jnp.allclose(e1, r1, atol=1e-2, rtol=1e-2)

    print("KERNEL_OK")
</pallas_src>

<mosaic_0001>
module attributes {stable_mosaic.version = 11 : i64} {
  func.func @_triplet_kernel(%arg0: memref<2x256xf32, #tpu.memory_space<vmem>>, %arg1: memref<2x256xf32, #tpu.memory_space<vmem>>, %arg2: memref<2x256xf32, #tpu.memory_space<vmem>>, %arg3: memref<256x128xbf16, #tpu.memory_space<vmem>>, %arg4: memref<1x128xf32, #tpu.memory_space<vmem>>, %arg5: memref<128x128xbf16, #tpu.memory_space<vmem>>, %arg6: memref<1x128xf32, #tpu.memory_space<vmem>>, %arg7: memref<2x128xf32, #tpu.memory_space<vmem>>, %arg8: memref<2x128xf32, #tpu.memory_space<vmem>>, %arg9: memref<2x128xf32, #tpu.memory_space<vmem>>) attributes {dimension_semantics = [], scalar_prefetch = 0 : i64, scratch_operands = 0 : i64, tpu.core_type = #tpu.core_type<tc>} {
    %c0 = arith.constant 0 : index
    %c0_0 = arith.constant 0 : index
    %0 = vector.load %arg3[%c0, %c0_0] : memref<256x128xbf16, #tpu.memory_space<vmem>>, vector<256x128xbf16>
    %c0_1 = arith.constant 0 : index
    %c0_2 = arith.constant 0 : index
    %1 = vector.load %arg4[%c0_1, %c0_2] : memref<1x128xf32, #tpu.memory_space<vmem>>, vector<1x128xf32>
    %c0_3 = arith.constant 0 : index
    %c0_4 = arith.constant 0 : index
    %2 = vector.load %arg5[%c0_3, %c0_4] : memref<128x128xbf16, #tpu.memory_space<vmem>>, vector<128x128xbf16>
    %c0_5 = arith.constant 0 : index
    %c0_6 = arith.constant 0 : index
    %3 = vector.load %arg6[%c0_5, %c0_6] : memref<1x128xf32, #tpu.memory_space<vmem>>, vector<1x128xf32>
    %c0_7 = arith.constant 0 : index
    %c0_8 = arith.constant 0 : index
    %4 = vector.load %arg0[%c0_7, %c0_8] : memref<2x256xf32, #tpu.memory_space<vmem>>, vector<2x256xf32>
    %5 = arith.truncf %4 : vector<2x256xf32> to vector<2x256xbf16>
    %cst = arith.constant dense<0.000000e+00> : vector<2x128xf32>
    %6 = tpu.matmul %5, %0, %cst {dimension_numbers = #tpu.dot_dimension_numbers<[1], [0], [0], [1], [0, 0, 1, 1], [], []>} : vector<2x256xbf16>, vector<256x128xbf16>, vector<2x128xf32> -> vector<2x128xf32>
    %7 = vector.broadcast %1 : vector<1x128xf32> to vector<2x128xf32>
    %8 = arith.addf %6, %7 : vector<2x128xf32>
    %cst_9 = arith.constant 0.000000e+00 : f32
    %9 = vector.broadcast %cst_9 : f32 to vector<2x128xf32>
    %10 = arith.maximumf %8, %9 : vector<2x128xf32>
    %11 = arith.truncf %10 : vector<2x128xf32> to vector<2x128xbf16>
    %cst_10 = arith.constant dense<0.000000e+00> : vector<2x128xf32>
    %12 = tpu.matmul %11, %2, %cst_10 {dimension_numbers = #tpu.dot_dimension_numbers<[1], [0], [0], [1], [0, 0, 1, 1], [], []>} : vector<2x128xbf16>, vector<128x128xbf16>, vector<2x128xf32> -> vector<2x128xf32>
    %13 = vector.broadcast %3 : vector<1x128xf32> to vector<2x128xf32>
    %14 = arith.addf %12, %13 : vector<2x128xf32>
    %c0_11 = arith.constant 0 : index
    %c0_12 = arith.constant 0 : index
    %15 = vector.load %arg7[%c0_11, %c0_12] : memref<2x128xf32, #tpu.memory_space<vmem>>, vector<2x128xf32>
    tpu.vector_store %arg7[%c0_11, %c0_12], %14 {strides = array<i32>} : memref<2x128xf32, #tpu.memory_space<vmem>>, vector<2x128xf32>,
    %c0_13 = arith.constant 0 : index
    %c0_14 = arith.constant 0 : index
    %16 = vector.load %arg1[%c0_13, %c0_14] : memref<2x256xf32, #tpu.memory_space<vmem>>, vector<2x256xf32>
    %17 = arith.truncf %16 : vector<2x256xf32> to vector<2x256xbf16>
    %cst_15 = arith.constant dense<0.000000e+00> : vector<2x128xf32>
    %18 = tpu.matmul %17, %0, %cst_15 {dimension_numbers = #tpu.dot_dimension_numbers<[1], [0], [0], [1], [0, 0, 1, 1], [], []>} : vector<2x256xbf16>, vector<256x128xbf16>, vector<2x128xf32> -> vector<2x128xf32>
    %19 = vector.broadcast %1 : vector<1x128xf32> to vector<2x128xf32>
    %20 = arith.addf %18, %19 : vector<2x128xf32>
    %cst_16 = arith.constant 0.000000e+00 : f32
    %21 = vector.broadcast %cst_16 : f32 to vector<2x128xf32>
    %22 = arith.maximumf %20, %21 : vector<2x128xf32>
    %23 = arith.truncf %22 : vector<2x128xf32> to vector<2x128xbf16>
    %cst_17 = arith.constant dense<0.000000e+00> : vector<2x128xf32>
    %24 = tpu.matmul %23, %2, %cst_17 {dimension_numbers = #tpu.dot_dimension_numbers<[1], [0], [0], [1], [0, 0, 1, 1], [], []>} : vector<2x128xbf16>, vector<128x128xbf16>, vector<2x128xf32> -> vector<2x128xf32>
    %25 = vector.broadcast %3 : vector<1x128xf32> to vector<2x128xf32>
    %26 = arith.addf %24, %25 : vector<2x128xf32>
    %c0_18 = arith.constant 0 : index
    %c0_19 = arith.constant 0 : index
    %27 = vector.load %arg8[%c0_18, %c0_19] : memref<2x128xf32, #tpu.memory_space<vmem>>, vector<2x128xf32>
    tpu.vector_store %arg8[%c0_18, %c0_19], %26 {strides = array<i32>} : memref<2x128xf32, #tpu.memory_space<vmem>>, vector<2x128xf32>,
    %c0_20 = arith.constant 0 : index
    %c0_21 = arith.constant 0 : index
    %28 = vector.load %arg2[%c0_20, %c0_21] : memref<2x256xf32, #tpu.memory_space<vmem>>, vector<2x256xf32>
    %29 = arith.truncf %28 : vector<2x256xf32> to vector<2x256xbf16>
    %cst_22 = arith.constant dense<0.000000e+00> : vector<2x128xf32>
    %30 = tpu.matmul %29, %0, %cst_22 {dimension_numbers = #tpu.dot_dimension_numbers<[1], [0], [0], [1], [0, 0, 1, 1], [], []>} : vector<2x256xbf16>, vector<256x128xbf16>, vector<2x128xf32> -> vector<2x128xf32>
    %31 = vector.broadcast %1 : vector<1x128xf32> to vector<2x128xf32>
    %32 = arith.addf %30, %31 : vector<2x128xf32>
    %cst_23 = arith.constant 0.000000e+00 : f32
    %33 = vector.broadcast %cst_23 : f32 to vector<2x128xf32>
    %34 = arith.maximumf %32, %33 : vector<2x128xf32>
    %35 = arith.truncf %34 : vector<2x128xf32> to vector<2x128xbf16>
    %cst_24 = arith.constant dense<0.000000e+00> : vector<2x128xf32>
    %36 = tpu.matmul %35, %2, %cst_24 {dimension_numbers = #tpu.dot_dimension_numbers<[1], [0], [0], [1], [0, 0, 1, 1], [], []>} : vector<2x128xbf16>, vector<128x128xbf16>, vector<2x128xf32> -> vector<2x128xf32>
    %37 = vector.broadcast %3 : vector<1x128xf32> to vector<2x128xf32>
    %38 = arith.addf %36, %37 : vector<2x128xf32>
    %c0_25 = arith.constant 0 : index
    %c0_26 = arith.constant 0 : index
    %39 = vector.load %arg9[%c0_25, %c0_26] : memref<2x128xf32, #tpu.memory_space<vmem>>, vector<2x128xf32>
    tpu.vector_store %arg9[%c0_25, %c0_26], %38 {strides = array<i32>} : memref<2x128xf32, #tpu.memory_space<vmem>>, vector<2x128xf32>,
    return
  }
}

</mosaic_0001>

<bundles_post_ra>
// kernel: _triplet_embed.1
= control target key start
LH: loop header
LB: loop body
LE: loop exit
PB: predicated region body
PF: predicated region fallthrough
CT: control target
= control target key end

     0   :  { %15 = vsyncpa [#allocation3], 0  ;;  %s1241_s0 = inlined_call_operand.hbm [shape: f32[2,256], index: 0, kind: input, shape index: {}]   ;;  %s1242_s1 = inlined_call_operand.hbm [shape: f32[2,256], index: 1, kind: input, shape index: {}]   ;;  %s1243_s2 = inlined_call_operand.hbm [shape: f32[2,256], index: 2, kind: input, shape index: {}]   ;;  %s1244_s3 = inlined_call_operand.hbm [shape: bf16[256,128], index: 3, kind: input, shape index: {}]   ;;  %s1245_s4 = inlined_call_operand.vmem [shape: f32[1,128], index: 4, kind: input, shape index: {}]   ;;  %s1246_s5 = inlined_call_operand.hbm [shape: bf16[128,128], index: 5, kind: input, shape index: {}]   ;;  %s1247_s6 = inlined_call_operand.vmem [shape: f32[1,128], index: 6, kind: input, shape index: {}]   ;;  %s1248_s7 = inlined_call_operand.hbm [shape: f32[2,128], index: 7, kind: output, shape index: {0}]   ;;  %s1249_s8 = inlined_call_operand.hbm [shape: f32[2,128], index: 8, kind: output, shape index: {1}]   ;;  %s1250_s9 = inlined_call_operand.hbm [shape: f32[2,128], index: 9, kind: output, shape index: {2}]  }
   0x1   :  { %16 = vsyncpa [#allocation6], 0 }
   0x2   :  { %17 = vsyncpa [#allocation9], 0 }
   0x3   :  { %18 = vsyncpa [#allocation4], 0 }
   0x4   :  { %19 = vsyncpa [#allocation13], 0  ;;  %s1023_s30 = smov [#allocation5]   ;;  %s1024_s11 = smov [#allocation8]  }
   0x5   :  { %s36_s10 = sshll.u32 %s1023_s30, 4  ;;  %s55_s12 = sshll.u32 %s1024_s11, 4  ;;  %s37_s10 = int_to_ptr.vmem [resolvable:$true] %s36_s10  ;;  %s56_s12 = int_to_ptr.vmem [resolvable:$true] %s55_s12 }
   0x6   :  { %s861_s13 = scalar_lea.vmem %s37_s10, 64  ;;  %p866_p1 = scmp.lt.s32.totalorder %s37_s10, %s37_s10 }
   0x7   :  { %p862_p0 = scmp.ne.s32.totalorder %s37_s10, %s861_s13  ;;  %p867_p2 = scmp.lt.s32.totalorder %s861_s13, %s861_s13 }
   0x9   :  { %p868_p3 = por %p867_p2, %p866_p1 }
   0xb   :  { %p869_p4 = pnand %p868_p3, %p862_p0 }
   0xd   :  { %872 = shalt.err (!%p869_p4)
}
   0xe   :  { %39 = dma.hbm_to_vmem [thread:$0]  %s1242_s1, 64, %s37_s10, [#allocation6]  }
   0xf   :  { %s881_s16 = scalar_lea.vmem %s56_s12, 2048  ;;  %p886_p6 = scmp.lt.s32.totalorder %s56_s12, %s56_s12 }
  0x10   :  { %p882_p5 = scmp.ne.s32.totalorder %s56_s12, %s881_s16  ;;  %p887_p7 = scmp.lt.s32.totalorder %s881_s16, %s881_s16 }
  0x12   :  { %p888_p8 = por %p887_p7, %p886_p6 }
  0x14   :  { %p889_p9 = pnand %p888_p8, %p882_p5 }
  0x16   :  { %892 = shalt.err (!%p889_p9)
}
  0x17   :  { %s1025_s17 = smov 64   ;;  %s1026_s18 = smov 4  }
  0x18   :  { %61 = dma.hbm_to_vmem [thread:$0]  %s1244_s3, 2048, %s56_s12, [#allocation9], %s1025_s17, %s1025_s17, %s1026_s18  }
  0x19   :  { %s1027_s21 = smov [#allocation2]   ;;  %s1028_s23 = smov [#allocation7]  }
  0x1a   :  { %s26_s22 = sshll.u32 %s1027_s21, 4  ;;  %s46_s1 = sshll.u32 %s1028_s23, 4  ;;  %s27_s22 = int_to_ptr.vmem [resolvable:$true] %s26_s22  ;;  %s47_s1 = int_to_ptr.vmem [resolvable:$true] %s46_s1 }
  0x1b   :  { %s901_s24 = scalar_lea.vmem %s27_s22, 64  ;;  %p906_p11 = scmp.lt.s32.totalorder %s27_s22, %s27_s22 }
  0x1c   :  { %p902_p10 = scmp.ne.s32.totalorder %s27_s22, %s901_s24  ;;  %p907_p12 = scmp.lt.s32.totalorder %s901_s24, %s901_s24 }
  0x1e   :  { %p908_p13 = por %p907_p12, %p906_p11 }
  0x20   :  { %p909_p0 = pnand %p908_p13, %p902_p10 }
  0x22   :  { %912 = shalt.err (!%p909_p0)
}
  0x23   :  { %29 = dma.hbm_to_vmem [thread:$0]  %s1241_s0, 64, %s27_s22, [#allocation3]  }
  0x24   :  { %s921_s27 = scalar_lea.vmem %s47_s1, 64  ;;  %p926_p2 = scmp.lt.s32.totalorder %s47_s1, %s47_s1 }
  0x25   :  { %p922_p1 = scmp.ne.s32.totalorder %s47_s1, %s921_s27  ;;  %p927_p3 = scmp.lt.s32.totalorder %s921_s27, %s921_s27 }
  0x27   :  { %p928_p4 = por %p927_p3, %p926_p2 }
  0x29   :  { %p929_p5 = pnand %p928_p4, %p922_p1 }
  0x2b   :  { %932 = shalt.err (!%p929_p5)
}
  0x2c   :  { %49 = dma.hbm_to_vmem [thread:$0]  %s1243_s2, 64, %s47_s1, [#allocation6]  }
  0x2d   :  { %s1029_s29 = smov [#allocation10]  }
  0x2e   :  { %s69_s30 = sshll.u32 %s1029_s29, 4  ;;  %s70_s30 = int_to_ptr.vmem [resolvable:$true] %s69_s30 }
  0x2f   :  { %s941_s10 = scalar_lea.vmem %s70_s30, 1024  ;;  %p946_p7 = scmp.lt.s32.totalorder %s70_s30, %s70_s30 }
  0x30   :  { %p942_p6 = scmp.ne.s32.totalorder %s70_s30, %s941_s10  ;;  %p947_p8 = scmp.lt.s32.totalorder %s941_s10, %s941_s10 }
  0x32   :  { %p948_p9 = por %p947_p8, %p946_p7 }
  0x34   :  { %p949_p10 = pnand %p948_p9, %p942_p6 }
  0x36   :  { %952 = shalt.err (!%p949_p10)
}
  0x37   :  { %75 = dma.hbm_to_vmem [thread:$0]  %s1246_s5, 1024, %s70_s30, [#allocation9], %s1025_s17, %s1025_s17, %s1026_s18  }
  0x38   :  { %1013 = dma.done.wait [#allocation3], 64  }
  0x39   :  { %1014 = vsyncadd [#allocation3], 4294967232 }
  0x3a   :  { %1015 = dma.done.wait [#allocation6], 128  }
  0x3b   :  { %1016 = vsyncadd [#allocation6], 4294967168 }
  0x3c   :  { %1017 = dma.done.wait [#allocation9], 3072  }
  0x3d   :  { %1018 = vsyncadd [#allocation9], 4294964224  ;;  %v1030_v0 = vmov 0.0   ;;  %v1107_v1 = vld [vmem:[#allocation8 + $0x78] sm:$0xff]   ;;  %v1112_v3 = vld [vmem:[#allocation8 + $0x70] sm:$0xff]   ;;  %vm1031_vm0 = vmmov 0  }
  0x3e   :  { %757 = vmatprep.subr.bf16.mxu1 %v1030_v0  ;;  %v1109_v2 = vld [vmem:[#allocation8 + $0x38] sm:$0xff]   ;;  %664 = vmatprep.subr.bf16.mxu0 %v1107_v1  ;;  %v1115_v4 = vld [vmem:[#allocation8 + $0x30] sm:$0xff]   ;;  %v1118_v5 = vld [vmem:[#allocation8 + $0x68] sm:$0xff]   ;;  %s1032_s13 = smov [#allocation11]  }
  0x3f   :  { %665 = vmatpush3.bf16.msra.mxu0 %v1109_v2  ;;  %v1121_v6 = vld [vmem:[#allocation8 + $0x28] sm:$0xff]   ;;  %v1124_v7 = vld [vmem:[#allocation8 + $0x60] sm:$0xff]   ;;  %v1130_v9 = vld [vmem:[#allocation8 + $0x58] sm:$0xff]   ;;  %773 = vmatprep.mubr.msk.bf16.mxu1 %vm1031_vm0, %v1030_v0  ;;  %s597_s14 = sshll.u32 %s1032_s13, 4  ;;  %s598_s14 = int_to_ptr.vmem [resolvable:$true] %s597_s14 }
  0x40   :  { %666 = vmatprep.subr.bf16.mxu0 %v1112_v3  ;;  %v1127_v8 = vld [vmem:[#allocation8 + $0x20] sm:$0xff]   ;;  %v1132_v10 = vld [vmem:[#allocation8 + $0x18] sm:$0xff]   ;;  %v1135_v11 = vld [vmem:[#allocation8 + $0x50] sm:$0xff]   ;;  %s953_s15 = scalar_lea.vmem %s598_s14, 32  ;;  %p958_p12 = scmp.lt.s32.totalorder %s598_s14, %s598_s14 }
  0x41   :  { %v635_v12 = vld.sshfl [vmem:[#allocation2] sm:$0x33 pattern:$0x76325410]  ;;  %v1140_v15 = vld [vmem:[#allocation8 + $0x48] sm:$0xff]   ;;  %v1142_v16 = vld [vmem:[#allocation10 + $0x38] sm:$0xff]   ;;  %p954_p11 = scmp.ne.s32.totalorder %s598_s14, %s953_s15  ;;  %p959_p13 = scmp.lt.s32.totalorder %s953_s15, %s953_s15 }
  0x42   :  { %v153_v13 = vcombine.high %v635_v12, %v635_v12  ;;  %v1138_v14 = vld [vmem:[#allocation8 + $0x10] sm:$0xff]   ;;  %758 = vmatpush3.bf16.msra.mxu1 %v1142_v16  ;;  %v842_v19 = vld [vmem:[#allocation8 + $0x8] sm:$0xff]   ;;  %v843_v20 = vld [vmem:[#allocation8 + $0x40] sm:$0xff]   ;;  %v156_v26 = vpack.c.bf16 %v635_v12, %v635_v12 }
  0x43   :  { %667 = vmatpush3.bf16.msra.mxu0 %v1115_v4  ;;  %v1147_v18 = vld [vmem:[#allocation10 + $0x30] sm:$0xff]   ;;  %759 = vmatprep.subr.bf16.mxu1 %v1030_v0  ;;  %v662_v21 = vld.sshfl [vmem:[#allocation5] sm:$0x33 pattern:$0x76325410]  ;;  %v1153_v22 = vld [vmem:[#allocation10 + $0x28] sm:$0xff]   ;;  %p960_p0 = por %p959_p13, %p958_p12 }
  0x44   :  { %668 = vmatprep.subr.bf16.mxu0 %v1118_v5  ;;  %v157_v17 = vpack.c.bf16 %v153_v13, %v153_v13  ;;  %v844_v23 = vld [vmem:[#allocation8] sm:$0xff]   ;;  %v406_v24 = vcombine.high %v662_v21, %v662_v21  ;;  %v1162_v28 = vld [vmem:[#allocation10 + $0x18] sm:$0xff]   ;;  %v409_v31 = vpack.c.bf16 %v662_v21, %v662_v21  ;;  %v850_v34 = vld [vmem:[#allocation10 + $0x10] sm:$0xff]  }
  0x45   :  { %v1157_v25 = vld [vmem:[#allocation10 + $0x20] sm:$0xff]   ;;  %v663_v29 = vld.sshfl [vmem:[#allocation7] sm:$0x33 pattern:$0x76325410]  ;;  %v851_v35 = vld [vmem:[#allocation10 + $0x8] sm:$0xff]   ;;  %p961_p1 = pnand %p960_p0, %p954_p11 }
  0x46   :  { %292 = vmatprep.mubr.bf16.mxu0 %v157_v17  ;;  %760 = vmatpush3.bf16.msra.mxu1 %v1147_v18  ;;  %v410_v27 = vpack.c.bf16 %v406_v24, %v406_v24  ;;  %v503_v30 = vcombine.high %v663_v29, %v663_v29  ;;  %v506_v33 = vpack.c.bf16 %v663_v29, %v663_v29  ;;  %v852_v36 = vld [vmem:[#allocation10] sm:$0xff]   ;;  %v636_v38 = vld [vmem:[%s1245_s4] ss:$0 sm:$0xff] }
  0x47   :  { %669 = vmatpush3.bf16.msra.mxu0 %v1121_v6  ;;  %761 = vmatprep.subr.bf16.mxu1 %v1030_v0  ;;  %v653_v62 = vld [vmem:[%s1247_s6] ss:$0 sm:$0xff] }
  0x48   :  { %670 = vmatprep.subr.bf16.mxu0 %v1124_v7  ;;  %v507_v32 = vpack.c.bf16 %v503_v30, %v503_v30 }
  0x4a   :  { %762 = vmatpush3.bf16.msra.mxu1 %v1153_v22 }
  0x4b   :  { %671 = vmatpush3.bf16.msra.mxu0 %v1127_v8  ;;  %763 = vmatprep.subr.bf16.mxu1 %v1030_v0 }
  0x4c   :  { %672 = vmatprep.subr.bf16.mxu0 %v1130_v9 }
  0x4e   :  { %764 = vmatpush3.bf16.msra.mxu1 %v1157_v25 }
  0x4f   :  { %673 = vmatpush3.bf16.msra.mxu0 %v1132_v10  ;;  %765 = vmatprep.subr.bf16.mxu1 %v1030_v0 }
  0x50   :  { %674 = vmatprep.subr.bf16.mxu0 %v1135_v11 }
  0x52   :  { %766 = vmatpush3.bf16.msra.mxu1 %v1162_v28 }
  0x53   :  { %675 = vmatpush3.bf16.msra.mxu0 %v1138_v14  ;;  %767 = vmatprep.subr.bf16.mxu1 %v1030_v0 }
  0x54   :  { %676 = vmatprep.subr.bf16.mxu0 %v1140_v15 }
  0x56   :  { %768 = vmatpush3.bf16.msra.mxu1 %v850_v34 }
  0x57   :  { %677 = vmatpush3.bf16.msra.mxu0 %v842_v19  ;;  %769 = vmatprep.subr.bf16.mxu1 %v1030_v0 }
  0x58   :  { %678 = vmatprep.subr.bf16.mxu0 %v843_v20 }
  0x5a   :  { %770 = vmatpush3.bf16.msra.mxu1 %v851_v35 }
  0x5b   :  { %679 = vmatpush3.bf16.msra.mxu0 %v844_v23  ;;  %771 = vmatprep.subr.bf16.mxu1 %v1030_v0 }
  0x5c   :  { %695 = vmatprep.subr.bf16.mxu0 %v1107_v1 }
  0x5e   :  { %293 = vmatmul.mubr.bf16.vlgmr.msra.gmra.mxu0 %v156_v26  ;;  %772 = vmatpush3.bf16.msra.mxu1 %v852_v36 }
  0x5f   :  { %696 = vmatpush3.bf16.msra.mxu0 %v1109_v2  ;;  %443 = vmatprep.mubr.bf16.mxu0 %v410_v27 }
  0x60   :  { %697 = vmatprep.subr.bf16.mxu0 %v1112_v3  ;;  %777 = vmatprep.subr.bf16.mxu1 %v1030_v0 }
  0x63   :  { %698 = vmatpush3.bf16.msra.mxu0 %v1115_v4 }
  0x64   :  { %699 = vmatprep.subr.bf16.mxu0 %v1118_v5 }
  0x67   :  { %700 = vmatpush3.bf16.msra.mxu0 %v1121_v6 }
  0x68   :  { %701 = vmatprep.subr.bf16.mxu0 %v1124_v7 }
  0x6b   :  { %702 = vmatpush3.bf16.msra.mxu0 %v1127_v8 }
  0x6c   :  { %703 = vmatprep.subr.bf16.mxu0 %v1130_v9 }
  0x6f   :  { %704 = vmatpush3.bf16.msra.mxu0 %v1132_v10 }
  0x70   :  { %705 = vmatprep.subr.bf16.mxu0 %v1135_v11 }
  0x73   :  { %706 = vmatpush3.bf16.msra.mxu0 %v1138_v14 }
  0x74   :  { %707 = vmatprep.subr.bf16.mxu0 %v1140_v15 }
  0x77   :  { %708 = vmatpush3.bf16.msra.mxu0 %v842_v19 }
  0x78   :  { %709 = vmatprep.subr.bf16.mxu0 %v843_v20 }
  0x7b   :  { %710 = vmatpush3.bf16.msra.mxu0 %v844_v23 }
  0x7c   :  { %726 = vmatprep.subr.bf16.mxu0 %v1107_v1 }
  0x7e   :  { %444 = vmatmul.mubr.bf16.vlgmr.msra.gmra.mxu0 %v409_v31 }
  0x7f   :  { %727 = vmatpush3.bf16.msra.mxu0 %v1109_v2  ;;  %540 = vmatprep.mubr.bf16.mxu0 %v507_v32 }
  0x80   :  { %728 = vmatprep.subr.bf16.mxu0 %v1112_v3 }
  0x83   :  { %729 = vmatpush3.bf16.msra.mxu0 %v1115_v4 }
  0x84   :  { %730 = vmatprep.subr.bf16.mxu0 %v1118_v5 }
  0x87   :  { %731 = vmatpush3.bf16.msra.mxu0 %v1121_v6 }
  0x88   :  { %732 = vmatprep.subr.bf16.mxu0 %v1124_v7 }
  0x8b   :  { %733 = vmatpush3.bf16.msra.mxu0 %v1127_v8 }
  0x8c   :  { %734 = vmatprep.subr.bf16.mxu0 %v1130_v9 }
  0x8f   :  { %735 = vmatpush3.bf16.msra.mxu0 %v1132_v10 }
  0x90   :  { %736 = vmatprep.subr.bf16.mxu0 %v1135_v11 }
  0x93   :  { %737 = vmatpush3.bf16.msra.mxu0 %v1138_v14 }
  0x94   :  { %738 = vmatprep.subr.bf16.mxu0 %v1140_v15 }
  0x97   :  { %739 = vmatpush3.bf16.msra.mxu0 %v842_v19 }
  0x98   :  { %740 = vmatprep.subr.bf16.mxu0 %v843_v20 }
  0x9b   :  { %741 = vmatpush3.bf16.msra.mxu0 %v844_v23 }
  0x9e   :  { %541 = vmatmul.mubr.bf16.vlgmr.msra.gmra.mxu0 %v506_v33 }
 0x11e   :  { %v680_v37 = vpop.f32.mrf.mxu0 }
 0x120   :  { %v681_v39 = vpop.f32.mrf.mxu0 }
 0x121   :  { %v682_v40 = vadd.f32 %v681_v39, %v680_v37 }
 0x122   :  { %v683_v41 = vpop.f32.mrf.mxu0 }
 0x123   :  { %v295_v42 = vadd.f32 %v682_v40, %v636_v38 }
 0x124   :  { %v684_v43 = vpop.f32.mrf.mxu0 }
 0x125   :  { %v300_v44 = vmax.f32 %v295_v42, 0.0 }
 0x127   :  { %v301_v45 = vpack.c.bf16 %v300_v44, %v300_v44 }
 0x129   :  { %774 = vmatmul.mubr.bf16.vlgmr.msra.gmra.mxu1 %v301_v45 }
 0x12a   :  { %778 = vmatpush3.bf16.msra.mxu1 %v1142_v16  ;;  %793 = vmatprep.mubr.msk.bf16.mxu1 %vm1031_vm0, %v1030_v0 }
 0x12b   :  { %779 = vmatprep.subr.bf16.mxu1 %v1030_v0 }
 0x12e   :  { %780 = vmatpush3.bf16.msra.mxu1 %v1147_v18 }
 0x12f   :  { %781 = vmatprep.subr.bf16.mxu1 %v1030_v0 }
 0x132   :  { %782 = vmatpush3.bf16.msra.mxu1 %v1153_v22 }
 0x133   :  { %783 = vmatprep.subr.bf16.mxu1 %v1030_v0 }
 0x136   :  { %784 = vmatpush3.bf16.msra.mxu1 %v1157_v25 }
 0x137   :  { %785 = vmatprep.subr.bf16.mxu1 %v1030_v0 }
 0x13a   :  { %786 = vmatpush3.bf16.msra.mxu1 %v1162_v28 }
 0x13b   :  { %787 = vmatprep.subr.bf16.mxu1 %v1030_v0 }
 0x13e   :  { %v711_v46 = vpop.f32.mrf.mxu0  ;;  %788 = vmatpush3.bf16.msra.mxu1 %v850_v34 }
 0x13f   :  { %789 = vmatprep.subr.bf16.mxu1 %v1030_v0 }
 0x140   :  { %v712_v47 = vpop.f32.mrf.mxu0 }
 0x141   :  { %v713_v48 = vadd.f32 %v712_v47, %v711_v46 }
 0x142   :  { %v714_v49 = vpop.f32.mrf.mxu0  ;;  %790 = vmatpush3.bf16.msra.mxu1 %v851_v35 }
 0x143   :  { %v446_v50 = vadd.f32 %v713_v48, %v636_v38  ;;  %791 = vmatprep.subr.bf16.mxu1 %v1030_v0 }
 0x144   :  { %v715_v51 = vpop.f32.mrf.mxu0 }
 0x145   :  { %v451_v52 = vmax.f32 %v446_v50, 0.0 }
 0x146   :  { %792 = vmatpush3.bf16.msra.mxu1 %v852_v36 }
 0x147   :  { %v452_v53 = vpack.c.bf16 %v451_v52, %v451_v52  ;;  %797 = vmatprep.subr.bf16.mxu1 %v1030_v0 }
 0x149   :  { %794 = vmatmul.mubr.bf16.vlgmr.msra.gmra.mxu1 %v452_v53 }
 0x14a   :  { %798 = vmatpush3.bf16.msra.mxu1 %v1142_v16  ;;  %813 = vmatprep.mubr.msk.bf16.mxu1 %vm1031_vm0, %v1030_v0 }
 0x14b   :  { %799 = vmatprep.subr.bf16.mxu1 %v1030_v0 }
 0x14e   :  { %800 = vmatpush3.bf16.msra.mxu1 %v1147_v18 }
 0x14f   :  { %801 = vmatprep.subr.bf16.mxu1 %v1030_v0 }
 0x152   :  { %802 = vmatpush3.bf16.msra.mxu1 %v1153_v22 }
 0x153   :  { %803 = vmatprep.subr.bf16.mxu1 %v1030_v0 }
 0x156   :  { %804 = vmatpush3.bf16.msra.mxu1 %v1157_v25 }
 0x157   :  { %805 = vmatprep.subr.bf16.mxu1 %v1030_v0 }
 0x15a   :  { %806 = vmatpush3.bf16.msra.mxu1 %v1162_v28 }
 0x15b   :  { %807 = vmatprep.subr.bf16.mxu1 %v1030_v0 }
 0x15e   :  { %v742_v54 = vpop.f32.mrf.mxu0  ;;  %808 = vmatpush3.bf16.msra.mxu1 %v850_v34 }
 0x15f   :  { %809 = vmatprep.subr.bf16.mxu1 %v1030_v0 }
 0x160   :  { %v743_v55 = vpop.f32.mrf.mxu0 }
 0x161   :  { %v744_v56 = vadd.f32 %v743_v55, %v742_v54 }
 0x162   :  { %v745_v57 = vpop.f32.mrf.mxu0  ;;  %810 = vmatpush3.bf16.msra.mxu1 %v851_v35 }
 0x163   :  { %v543_v58 = vadd.f32 %v744_v56, %v636_v38  ;;  %811 = vmatprep.subr.bf16.mxu1 %v1030_v0 }
 0x164   :  { %v746_v59 = vpop.f32.mrf.mxu0 }
 0x165   :  { %v548_v60 = vmax.f32 %v543_v58, 0.0 }
 0x166   :  { %812 = vmatpush3.bf16.msra.mxu1 %v852_v36 }
 0x167   :  { %v549_v61 = vpack.c.bf16 %v548_v60, %v548_v60 }
 0x169   :  { %814 = vmatmul.mubr.bf16.vlgmr.msra.gmra.mxu1 %v549_v61 }
 0x1e9   :  { %v390_v63 = vpop.f32.mrf.mxu1 }
 0x1ea   :  { %v391_v1 = vadd.f32 %v653_v62, %v390_v63 }
 0x1eb   :  { %v775_v2 = vpop.f32.mrf.mxu1 }
 0x1ec   :  { %396 = vst [vmem:[#allocation11] sm:$0x3] %v391_v1 }
 0x1ed   :  { %v393_v3 = vpop.f32.mrf.mxu1 }
 0x1ee   :  { %964 = shalt.err (!%p961_p1)
}
 0x1ef   :  { %600 = dma.vmem_to_hbm [thread:$0]  %s598_s14, 32, %s1248_s7, [#allocation4]   ;;  %v776_v0 = vpop.f32.mrf.mxu1 }
 0x1f0   :  { %s1033_s6 = smov [#allocation12]  }
 0x1f1   :  { %s607_s18 = sshll.u32 %s1033_s6, 4  ;;  %s608_s18 = int_to_ptr.vmem [resolvable:$true] %s607_s18 }
 0x1f2   :  { %s973_s19 = scalar_lea.vmem %s608_s18, 32  ;;  %p978_p3 = scmp.lt.s32.totalorder %s608_s18, %s608_s18 }
 0x1f3   :  { %p974_p2 = scmp.ne.s32.totalorder %s608_s18, %s973_s19  ;;  %p979_p4 = scmp.lt.s32.totalorder %s973_s19, %s973_s19 }
 0x1f5   :  { %p980_p5 = por %p979_p4, %p978_p3 }
 0x1f7   :  { %p981_p6 = pnand %p980_p5, %p974_p2 }
 0x209   :  { %v487_v4 = vpop.f32.mrf.mxu1 }
 0x20a   :  { %v488_v5 = vadd.f32 %v653_v62, %v487_v4 }
 0x20b   :  { %v795_v6 = vpop.f32.mrf.mxu1 }
 0x20c   :  { %493 = vst [vmem:[#allocation12] sm:$0x3] %v488_v5 }
 0x20d   :  { %v490_v7 = vpop.f32.mrf.mxu1 }
 0x20e   :  { %984 = shalt.err (!%p981_p6)
}
 0x20f   :  { %610 = dma.vmem_to_hbm [thread:$0]  %s608_s18, 32, %s1249_s8, [#allocation13]   ;;  %v796_v8 = vpop.f32.mrf.mxu1 }
 0x210   :  { %s1034_s7 = smov [#allocation14]  }
 0x211   :  { %s617_s22 = sshll.u32 %s1034_s7, 4  ;;  %s618_s22 = int_to_ptr.vmem [resolvable:$true] %s617_s22 }
 0x212   :  { %s993_s23 = scalar_lea.vmem %s618_s22, 32  ;;  %p998_p8 = scmp.lt.s32.totalorder %s618_s22, %s618_s22 }
 0x213   :  { %p994_p7 = scmp.ne.s32.totalorder %s618_s22, %s993_s23  ;;  %p999_p9 = scmp.lt.s32.totalorder %s993_s23, %s993_s23 }
 0x215   :  { %p1000_p10 = por %p999_p9, %p998_p8 }
 0x217   :  { %p1001_p11 = pnand %p1000_p10, %p994_p7 }
 0x229   :  { %v584_v9 = vpop.f32.mrf.mxu1 }
 0x22a   :  { %v585_v10 = vadd.f32 %v653_v62, %v584_v9 }
 0x22b   :  { %v815_v11 = vpop.f32.mrf.mxu1 }
 0x22c   :  { %590 = vst [vmem:[#allocation14] sm:$0x3] %v585_v10 }
 0x22d   :  { %v587_v12 = vpop.f32.mrf.mxu1 }
 0x22e   :  { %1004 = shalt.err (!%p1001_p11)
}
 0x22f   :  { %620 = dma.vmem_to_hbm [thread:$0]  %s618_s22, 32, %s1250_s9, [#allocation13]   ;;  %v816_v13 = vpop.f32.mrf.mxu1 }
 0x230   :  { %1019 = dma.done.wait [#allocation4], 32  }
 0x231   :  { %1020 = vsyncadd [#allocation4], 4294967264 }
 0x232   :  { %1021 = dma.done.wait [#allocation13], 64  }
 0x233   :  { %1022 = vsyncadd [#allocation13], 4294967232 }
 0x234   :  { %630 = vsyncpa [#allocation3], 1 }
 0x235   :  { %631 = vsyncpa [#allocation6], 1 }
 0x236   :  { %632 = vsyncpa [#allocation9], 1 }
 0x237   :  { %633 = vsyncpa [#allocation4], 1 }
 0x238   :  { %634 = vsyncpa [#allocation13], 1 }

</bundles_post_ra>
